<compile_context>
chip_gen: v5e
topology: v5e:2x2
jax: 0.10.0
libtpu: 0.0.40
codegen_flags: <defaults>
</compile_context>

<pallas_src>
import jax
import jax.numpy as jnp
from jax.experimental import pallas as pl
from jax.experimental.pallas import tpu as pltpu

LAMBDA_STRUCTURE = 10.0
LEVEL_WEIGHTS = (0.5, 0.3, 0.2)
LEVEL_CHANNELS = (("conv1", 3, 8, 1), ("conv2", 8, 16, 2), ("conv3", 16, 32, 2))


def _conv_out(n, stride):
    return (n + 2 - 3) // stride + 1  # kernel 3, pad 1


# ----------------------------------------------------------------------------
# Constant construction (trace time, tiny)
# ----------------------------------------------------------------------------
def _make_sel(h_in, h_out, stride):
    """(6*h_out, 2*h_in) 0/1 matrix.  Row (dy*2 + img)*h_out + h selects input row
    img*h_in + (stride*h + dy - 1); rows whose source index is out of range are all
    zero (the H zero-padding).  Folds H-pad, H-stride and the 3x3 tap row-shift into
    one matmul, block-diagonally over the (real, fake) image pair."""
    h = jnp.arange(h_out)
    cols = jnp.arange(h_in)
    blocks = []
    for dy in range(3):
        src = stride * h + dy - 1
        s = ((cols[None, :] == src[:, None]) &
             (src[:, None] >= 0) & (src[:, None] < h_in)).astype(jnp.float32)
        z = jnp.zeros_like(s)
        blocks.append(jnp.concatenate(
            [jnp.concatenate([s, z], axis=1),
             jnp.concatenate([z, s], axis=1)], axis=0))
    return jnp.concatenate(blocks, axis=0)


def _make_bands(w, stride, w_in_dim, w_out_dim):
    """w: (3,3,Cin,Cout) HWIO.  Returns (3, w_in_dim*Cin, w_out_dim*Cout) with
    bands[dy][wi*Cin+ci, wo*Cout+co] = w[dy, wi - stride*wo + 1, ci, co]
    (zero outside the 3-tap band).  W-padding (pad=1) and W-stride fold in, operating
    directly on the UNPADDED merged (w, c) lane layout."""
    kh, kw, cin, cout = w.shape
    wi = jnp.arange(w_in_dim)[:, None]
    wo = jnp.arange(w_out_dim)[None, :]
    dx = wi - stride * wo + 1                                     # (Wi, Wo)
    valid = (dx >= 0) & (dx < kw)
    taps = jnp.take(w, jnp.clip(dx, 0, kw - 1), axis=1)           # (3, Wi, Wo, Cin, Cout)
    taps = jnp.where(valid[None, :, :, None, None], taps, 0.0)
    return jnp.transpose(taps, (0, 1, 3, 2, 4)).reshape(
        kh, w_in_dim * cin, w_out_dim * cout)


# ----------------------------------------------------------------------------
# Fully fused 3-level perceptual net + L1 partial-sum kernel
# ----------------------------------------------------------------------------
def _fused_kernel(level_meta):
    # level_meta: static tuple of (h_out, n_out, scale) per level
    def kernel(x_ref, s1, w1, b1, s2, w2, b2, s3, w3, b3, loss_ref):
        sel = (s1, s2, s3)
        band = (w1, w2, w3)
        bias = (b1, b2, b3)
        feat = x_ref[...]                          # (2*H, W*Cin) bf16, rows = [real; fake]
        loss_acc = jnp.zeros((1, 128), jnp.float32)
        for (h_out, n_out, scale), s_ref, w_ref, b_ref in zip(level_meta, sel, band, bias):
            # 3 shifted/strided row windows for both images, stacked along M.
            y = jnp.dot(s_ref[...], feat,
                        preferred_element_type=jnp.float32).astype(jnp.bfloat16)
            acc = jnp.zeros((2 * h_out, n_out), jnp.float32)
            for dy in range(3):
                acc = acc + jnp.dot(y[dy * 2 * h_out:(dy + 1) * 2 * h_out, :],
                                    w_ref[dy], preferred_element_type=jnp.float32)
            acc = jnp.maximum(acc + b_ref[...], 0.0)            # bias + ReLU in f32
            # fused weighted-L1 partial: |fake - real|, reduced over rows only (lane-dense)
            part = jnp.sum(jnp.abs(acc[h_out:2 * h_out, :] - acc[:h_out, :]),
                           axis=0, keepdims=True)               # (1, n_out)
            if n_out != 128:                                    # not taken at test sizes
                part = part.reshape(n_out // 128, 128).sum(axis=0, keepdims=True)
            loss_acc = loss_acc + scale * part
            feat = acc.astype(jnp.bfloat16)                     # next level's input (VMEM only)
        loss_ref[...] = loss_acc
    return kernel


# ----------------------------------------------------------------------------
# Synthetic perceptual net params (3 conv+ReLU stages, deterministic init)
# ----------------------------------------------------------------------------
def init_perceptual_params(key):
    def init_conv(k, cin, cout):
        kw_, kb_ = jax.random.split(k)
        fan_in = cin * 9
        w = jax.random.normal(kw_, (3, 3, cin, cout), jnp.float32) / jnp.sqrt(fan_in)
        b = 0.01 * jax.random.normal(kb_, (cout,), jnp.float32)
        return w, b

    k1, k2, k3 = jax.random.split(key, 3)
    return {"conv1": init_conv(k1, 3, 8),
            "conv2": init_conv(k2, 8, 16),
            "conv3": init_conv(k3, 16, 32)}


# ----------------------------------------------------------------------------
# StructuralLoss forward
# ----------------------------------------------------------------------------
@jax.jit
def structural_loss(params, real_A, fake_B, real_B, fake_A):
    Nb, C, H, W = real_A.shape
    assert C == 3

    # (Nb, pair, role, H, W, C): pair 0 = (real_A, fake_B), pair 1 = (real_B, fake_A)
    imgs = jnp.stack([jnp.stack([real_A, fake_B], axis=1),
                      jnp.stack([real_B, fake_A], axis=1)], axis=1)   # (Nb,2,2,C,H,W)
    x = jnp.transpose(imgs, (0, 1, 2, 4, 5, 3))                       # NHWC
    x = jnp.pad(x, ((0, 0),) * 5 + ((0, 1),))                         # Cin 3 -> 4 (lane align)
    x = x.reshape(Nb, 2, 2, H, W * 4).reshape(Nb, 2, 2 * H, W * 4)    # [real rows; fake rows]
    x = x.astype(jnp.bfloat16)

    # Per-level constants (selection matrices, banded weights, tiled biases).
    consts, level_meta = [], []
    h_in, w_in = H, W
    flops_per_step = 0
    for li, (name, cin, cout, stride) in enumerate(LEVEL_CHANNELS):
        wgt, b = params[name]
        if li == 0:
            wgt = jnp.pad(wgt, ((0, 0), (0, 0), (0, 1), (0, 0)))      # Cin 3 -> 4
            cin = 4
        h_out, w_out = _conv_out(h_in, stride), _conv_out(w_in, stride)
        n_out = w_out * cout
        assert n_out % 128 == 0, "Wout*Cout must be a multiple of 128"
        sel = _make_sel(h_in, h_out, stride).astype(jnp.bfloat16)     # (6*h_out, 2*h_in)
        bnd = _make_bands(wgt, stride, w_in, w_out).astype(jnp.bfloat16)  # (3, w_in*cin, n_out)
        bias = jnp.tile(b.astype(jnp.float32), w_out).reshape(1, n_out)
        consts += [sel, bnd, bias]
        scale = LEVEL_WEIGHTS[li] / float(Nb * cout * h_out * w_out)  # L1Loss "mean" denom
        level_meta.append((h_out, n_out, scale))
        k_in = w_in * cin
        flops_per_step += 2 * (6 * h_out) * (2 * h_in) * k_in \
                        + 2 * 3 * (2 * h_out) * k_in * n_out
        h_in, w_in = h_out, w_out

    in_specs = [pl.BlockSpec((None, None, 2 * H, W * 4), lambda i, p: (i, p, 0, 0))]
    for c in consts:                                   # VMEM-resident constants
        if c.ndim == 2:
            in_specs.append(pl.BlockSpec(c.shape, lambda i, p: (0, 0)))
        else:
            in_specs.append(pl.BlockSpec(c.shape, lambda i, p: (0, 0, 0)))
    out_spec = pl.BlockSpec((None, None, 1, 128), lambda i, p: (i, p, 0, 0))

    bytes_accessed = (x.size * 2
                      + sum(int(c.size) * c.dtype.itemsize for c in consts)
                      + Nb * 2 * 128 * 4)

    partials = pl.pallas_call(
        _fused_kernel(tuple(level_meta)),
        grid=(Nb, 2),
        in_specs=in_specs,
        out_specs=out_spec,
        out_shape=jax.ShapeDtypeStruct((Nb, 2, 1, 128), jnp.float32),
        compiler_params=pltpu.CompilerParams(
            dimension_semantics=("parallel", "parallel"),
            vmem_limit_bytes=32 * 1024 * 1024),
        cost_estimate=pl.CostEstimate(
            flops=int(flops_per_step * Nb * 2), transcendentals=0,
            bytes_accessed=int(bytes_accessed)),
    )(x, *consts)

    per_pair = jnp.sum(partials, axis=(0, 2, 3)) * LAMBDA_STRUCTURE   # (2,)
    loss_A, loss_B = per_pair[0], per_pair[1]
    return {"struct_loss_A": loss_A,
            "struct_loss_B": loss_B,
            "total_struct_loss": loss_A + loss_B}


# ----------------------------------------------------------------------------
# Pure-JAX f32 reference (sanity check only)
# ----------------------------------------------------------------------------
def _ref_perceptual(params, x_nchw):
    x = x_nchw.astype(jnp.float32)
    feats = []
    for name, _, _, stride in LEVEL_CHANNELS:
        w, b = params[name]
        x = jax.lax.conv_general_dilated(
            x, w, (stride, stride), ((1, 1), (1, 1)),
            dimension_numbers=("NCHW", "HWIO", "NCHW"))
        x = jnp.maximum(x + b.reshape(1, -1, 1, 1), 0.0)
        feats.append(x)
    return feats


def _ref_loss(params, real_A, fake_B, real_B, fake_A):
    ra = _ref_perceptual(params, real_A)
    fb = _ref_perceptual(params, fake_B)
    rb = _ref_perceptual(params, real_B)
    fa = _ref_perceptual(params, fake_A)
    sA = sum(w * jnp.mean(jnp.abs(f - r))
             for w, f, r in zip(LEVEL_WEIGHTS, fb, ra)) * LAMBDA_STRUCTURE
    sB = sum(w * jnp.mean(jnp.abs(f - r))
             for w, f, r in zip(LEVEL_WEIGHTS, fa, rb)) * LAMBDA_STRUCTURE
    return sA, sB


# ----------------------------------------------------------------------------
if __name__ == "__main__":
    key = jax.random.PRNGKey(0)
    kp, ka, kb, kc, kd = jax.random.split(key, 5)

    params = init_perceptual_params(kp)

    shape = (2, 3, 16, 16)  # N, C, H, W (PyTorch NCHW)
    real_A = jax.random.normal(ka, shape, jnp.float32)
    fake_B = jax.random.normal(kb, shape, jnp.float32)
    real_B = jax.random.normal(kc, shape, jnp.float32)
    fake_A = jax.random.normal(kd, shape, jnp.float32)

    out = structural_loss(params, real_A, fake_B, real_B, fake_A)
    out = jax.tree_util.tree_map(jax.block_until_ready, out)

    # sanity check vs pure-JAX f32 reference (loose tolerance for bf16 MXU path)
    ref_A, ref_B = _ref_loss(params, real_A, fake_B, real_B, fake_A)
    assert jnp.allclose(out["struct_loss_A"], ref_A, rtol=5e-2, atol=1e-2), (out["struct_loss_A"], ref_A)
    assert jnp.allclose(out["struct_loss_B"], ref_B, rtol=5e-2, atol=1e-2), (out["struct_loss_B"], ref_B)
    assert jnp.allclose(out["total_struct_loss"], ref_A + ref_B, rtol=5e-2, atol=1e-2)

    print("KERNEL_OK")
</pallas_src>

<mosaic_0001>
module attributes {stable_mosaic.version = 11 : i64} {
  func.func @kernel(%arg0: i32, %arg1: i32, %arg2: memref<1x1x32x64xbf16, #tpu.memory_space<vmem>>, %arg3: memref<96x32xbf16, #tpu.memory_space<vmem>>, %arg4: memref<3x64x128xbf16, #tpu.memory_space<vmem>>, %arg5: memref<1x128xf32, #tpu.memory_space<vmem>>, %arg6: memref<48x32xbf16, #tpu.memory_space<vmem>>, %arg7: memref<3x128x128xbf16, #tpu.memory_space<vmem>>, %arg8: memref<1x128xf32, #tpu.memory_space<vmem>>, %arg9: memref<24x16xbf16, #tpu.memory_space<vmem>>, %arg10: memref<3x128x128xbf16, #tpu.memory_space<vmem>>, %arg11: memref<1x128xf32, #tpu.memory_space<vmem>>, %arg12: memref<1x1x1x128xf32, #tpu.memory_space<vmem>>) attributes {dimension_semantics = [#tpu.dimension_semantics<parallel>, #tpu.dimension_semantics<parallel>], iteration_bounds = array<i64: 2, 2>, scalar_prefetch = 0 : i64, scratch_operands = 0 : i64, tpu.core_type = #tpu.core_type<tc>, window_params = [{transform_indices = @transform_0, window_bounds = array<i64: 1, 1, 32, 64>}, {pipeline_mode = #tpu.pipeline_mode<synchronous>, transform_indices = @transform_1, window_bounds = array<i64: 96, 32>}, {pipeline_mode = #tpu.pipeline_mode<synchronous>, transform_indices = @transform_2, window_bounds = array<i64: 3, 64, 128>}, {pipeline_mode = #tpu.pipeline_mode<synchronous>, transform_indices = @transform_3, window_bounds = array<i64: 1, 128>}, {pipeline_mode = #tpu.pipeline_mode<synchronous>, transform_indices = @transform_4, window_bounds = array<i64: 48, 32>}, {pipeline_mode = #tpu.pipeline_mode<synchronous>, transform_indices = @transform_5, window_bounds = array<i64: 3, 128, 128>}, {pipeline_mode = #tpu.pipeline_mode<synchronous>, transform_indices = @transform_6, window_bounds = array<i64: 1, 128>}, {pipeline_mode = #tpu.pipeline_mode<synchronous>, transform_indices = @transform_7, window_bounds = array<i64: 24, 16>}, {pipeline_mode = #tpu.pipeline_mode<synchronous>, transform_indices = @transform_8, window_bounds = array<i64: 3, 128, 128>}, {pipeline_mode = #tpu.pipeline_mode<synchronous>, transform_indices = @transform_9, window_bounds = array<i64: 1, 128>}, {transform_indices = @transform_10, window_bounds = array<i64: 1, 1, 1, 128>}]} {
    %c0 = arith.constant 0 : index
    %c0_0 = arith.constant 0 : index
    %c0_1 = arith.constant 0 : index
    %c0_2 = arith.constant 0 : index
    %0 = vector.load %arg2[%c0, %c0_0, %c0_1, %c0_2] : memref<1x1x32x64xbf16, #tpu.memory_space<vmem>>, vector<1x1x32x64xbf16>
    %1 = vector.shape_cast %0 : vector<1x1x32x64xbf16> to vector<32x64xbf16>
    %cst = arith.constant 0.000000e+00 : f32
    %2 = vector.broadcast %cst : f32 to vector<1x128xf32>
    %c0_3 = arith.constant 0 : index
    %c0_4 = arith.constant 0 : index
    %3 = vector.load %arg3[%c0_3, %c0_4] : memref<96x32xbf16, #tpu.memory_space<vmem>>, vector<96x32xbf16>
    %cst_5 = arith.constant dense<0.000000e+00> : vector<96x64xf32>
    %4 = tpu.matmul %3, %1, %cst_5 {dimension_numbers = #tpu.dot_dimension_numbers<[1], [0], [0], [1], [0, 0, 1, 1], [], []>} : vector<96x32xbf16>, vector<32x64xbf16>, vector<96x64xf32> -> vector<96x64xf32>
    %5 = arith.truncf %4 : vector<96x64xf32> to vector<96x64xbf16>
    %cst_6 = arith.constant 0.000000e+00 : f32
    %6 = vector.broadcast %cst_6 : f32 to vector<32x128xf32>
    %7 = vector.extract_strided_slice %5 {offsets = [0, 0], sizes = [32, 64], strides = [1, 1]} : vector<96x64xbf16> to vector<32x64xbf16>
    %c0_7 = arith.constant 0 : index
    %c0_8 = arith.constant 0 : index
    %c0_9 = arith.constant 0 : index
    %8 = vector.load %arg4[%c0_7, %c0_8, %c0_9] : memref<3x64x128xbf16, #tpu.memory_space<vmem>>, vector<1x64x128xbf16>
    %9 = vector.shape_cast %8 : vector<1x64x128xbf16> to vector<64x128xbf16>
    %cst_10 = arith.constant dense<0.000000e+00> : vector<32x128xf32>
    %10 = tpu.matmul %7, %9, %cst_10 {dimension_numbers = #tpu.dot_dimension_numbers<[1], [0], [0], [1], [0, 0, 1, 1], [], []>} : vector<32x64xbf16>, vector<64x128xbf16>, vector<32x128xf32> -> vector<32x128xf32>
    %11 = arith.addf %6, %10 : vector<32x128xf32>
    %12 = vector.extract_strided_slice %5 {offsets = [32, 0], sizes = [32, 64], strides = [1, 1]} : vector<96x64xbf16> to vector<32x64xbf16>
    %c1 = arith.constant 1 : index
    %c0_11 = arith.constant 0 : index
    %c0_12 = arith.constant 0 : index
    %13 = vector.load %arg4[%c1, %c0_11, %c0_12] : memref<3x64x128xbf16, #tpu.memory_space<vmem>>, vector<1x64x128xbf16>
    %14 = vector.shape_cast %13 : vector<1x64x128xbf16> to vector<64x128xbf16>
    %cst_13 = arith.constant dense<0.000000e+00> : vector<32x128xf32>
    %15 = tpu.matmul %12, %14, %cst_13 {dimension_numbers = #tpu.dot_dimension_numbers<[1], [0], [0], [1], [0, 0, 1, 1], [], []>} : vector<32x64xbf16>, vector<64x128xbf16>, vector<32x128xf32> -> vector<32x128xf32>
    %16 = arith.addf %11, %15 : vector<32x128xf32>
    %17 = vector.extract_strided_slice %5 {offsets = [64, 0], sizes = [32, 64], strides = [1, 1]} : vector<96x64xbf16> to vector<32x64xbf16>
    %c2 = arith.constant 2 : index
    %c0_14 = arith.constant 0 : index
    %c0_15 = arith.constant 0 : index
    %18 = vector.load %arg4[%c2, %c0_14, %c0_15] : memref<3x64x128xbf16, #tpu.memory_space<vmem>>, vector<1x64x128xbf16>
    %19 = vector.shape_cast %18 : vector<1x64x128xbf16> to vector<64x128xbf16>
    %cst_16 = arith.constant dense<0.000000e+00> : vector<32x128xf32>
    %20 = tpu.matmul %17, %19, %cst_16 {dimension_numbers = #tpu.dot_dimension_numbers<[1], [0], [0], [1], [0, 0, 1, 1], [], []>} : vector<32x64xbf16>, vector<64x128xbf16>, vector<32x128xf32> -> vector<32x128xf32>
    %21 = arith.addf %16, %20 : vector<32x128xf32>
    %c0_17 = arith.constant 0 : index
    %c0_18 = arith.constant 0 : index
    %22 = vector.load %arg5[%c0_17, %c0_18] : memref<1x128xf32, #tpu.memory_space<vmem>>, vector<1x128xf32>
    %23 = vector.broadcast %22 : vector<1x128xf32> to vector<32x128xf32>
    %24 = arith.addf %21, %23 : vector<32x128xf32>
    %cst_19 = arith.constant 0.000000e+00 : f32
    %25 = vector.broadcast %cst_19 : f32 to vector<32x128xf32>
    %26 = arith.maximumf %24, %25 : vector<32x128xf32>
    %27 = vector.extract_strided_slice %26 {offsets = [16, 0], sizes = [16, 128], strides = [1, 1]} : vector<32x128xf32> to vector<16x128xf32>
    %28 = vector.extract_strided_slice %26 {offsets = [0, 0], sizes = [16, 128], strides = [1, 1]} : vector<32x128xf32> to vector<16x128xf32>
    %29 = arith.subf %27, %28 : vector<16x128xf32>
    %30 = math.absf %29 : vector<16x128xf32>
    %cst_20 = arith.constant dense<0.000000e+00> : vector<128xf32>
    %31 = vector.multi_reduction <add>, %30, %cst_20 [0] : vector<16x128xf32> to vector<128xf32>
    %32 = vector.shape_cast %31 : vector<128xf32> to vector<1x128xf32>
    %cst_21 = arith.constant 1.22070313E-4 : f32
    %33 = vector.broadcast %cst_21 : f32 to vector<1x128xf32>
    %34 = arith.mulf %33, %32 : vector<1x128xf32>
    %35 = arith.addf %2, %34 : vector<1x128xf32>
    %36 = arith.truncf %26 : vector<32x128xf32> to vector<32x128xbf16>
    %c0_22 = arith.constant 0 : index
    %c0_23 = arith.constant 0 : index
    %37 = vector.load %arg6[%c0_22, %c0_23] : memref<48x32xbf16, #tpu.memory_space<vmem>>, vector<48x32xbf16>
    %cst_24 = arith.constant dense<0.000000e+00> : vector<48x128xf32>
    %38 = tpu.matmul %37, %36, %cst_24 {dimension_numbers = #tpu.dot_dimension_numbers<[1], [0], [0], [1], [0, 0, 1, 1], [], []>} : vector<48x32xbf16>, vector<32x128xbf16>, vector<48x128xf32> -> vector<48x128xf32>
    %39 = arith.truncf %38 : vector<48x128xf32> to vector<48x128xbf16>
    %cst_25 = arith.constant 0.000000e+00 : f32
    %40 = vector.broadcast %cst_25 : f32 to vector<16x128xf32>
    %41 = vector.extract_strided_slice %39 {offsets = [0, 0], sizes = [16, 128], strides = [1, 1]} : vector<48x128xbf16> to vector<16x128xbf16>
    %c0_26 = arith.constant 0 : index
    %c0_27 = arith.constant 0 : index
    %c0_28 = arith.constant 0 : index
    %42 = vector.load %arg7[%c0_26, %c0_27, %c0_28] : memref<3x128x128xbf16, #tpu.memory_space<vmem>>, vector<1x128x128xbf16>
    %43 = vector.shape_cast %42 : vector<1x128x128xbf16> to vector<128x128xbf16>
    %cst_29 = arith.constant dense<0.000000e+00> : vector<16x128xf32>
    %44 = tpu.matmul %41, %43, %cst_29 {dimension_numbers = #tpu.dot_dimension_numbers<[1], [0], [0], [1], [0, 0, 1, 1], [], []>} : vector<16x128xbf16>, vector<128x128xbf16>, vector<16x128xf32> -> vector<16x128xf32>
    %45 = arith.addf %40, %44 : vector<16x128xf32>
    %46 = vector.extract_strided_slice %39 {offsets = [16, 0], sizes = [16, 128], strides = [1, 1]} : vector<48x128xbf16> to vector<16x128xbf16>
    %c1_30 = arith.constant 1 : index
    %c0_31 = arith.constant 0 : index
    %c0_32 = arith.constant 0 : index
    %47 = vector.load %arg7[%c1_30, %c0_31, %c0_32] : memref<3x128x128xbf16, #tpu.memory_space<vmem>>, vector<1x128x128xbf16>
    %48 = vector.shape_cast %47 : vector<1x128x128xbf16> to vector<128x128xbf16>
    %cst_33 = arith.constant dense<0.000000e+00> : vector<16x128xf32>
    %49 = tpu.matmul %46, %48, %cst_33 {dimension_numbers = #tpu.dot_dimension_numbers<[1], [0], [0], [1], [0, 0, 1, 1], [], []>} : vector<16x128xbf16>, vector<128x128xbf16>, vector<16x128xf32> -> vector<16x128xf32>
    %50 = arith.addf %45, %49 : vector<16x128xf32>
    %51 = vector.extract_strided_slice %39 {offsets = [32, 0], sizes = [16, 128], strides = [1, 1]} : vector<48x128xbf16> to vector<16x128xbf16>
    %c2_34 = arith.constant 2 : index
    %c0_35 = arith.constant 0 : index
    %c0_36 = arith.constant 0 : index
    %52 = vector.load %arg7[%c2_34, %c0_35, %c0_36] : memref<3x128x128xbf16, #tpu.memory_space<vmem>>, vector<1x128x128xbf16>
    %53 = vector.shape_cast %52 : vector<1x128x128xbf16> to vector<128x128xbf16>
    %cst_37 = arith.constant dense<0.000000e+00> : vector<16x128xf32>
    %54 = tpu.matmul %51, %53, %cst_37 {dimension_numbers = #tpu.dot_dimension_numbers<[1], [0], [0], [1], [0, 0, 1, 1], [], []>} : vector<16x128xbf16>, vector<128x128xbf16>, vector<16x128xf32> -> vector<16x128xf32>
    %55 = arith.addf %50, %54 : vector<16x128xf32>
    %c0_38 = arith.constant 0 : index
    %c0_39 = arith.constant 0 : index
    %56 = vector.load %arg8[%c0_38, %c0_39] : memref<1x128xf32, #tpu.memory_space<vmem>>, vector<1x128xf32>
    %57 = vector.broadcast %56 : vector<1x128xf32> to vector<16x128xf32>
    %58 = arith.addf %55, %57 : vector<16x128xf32>
    %cst_40 = arith.constant 0.000000e+00 : f32
    %59 = vector.broadcast %cst_40 : f32 to vector<16x128xf32>
    %60 = arith.maximumf %58, %59 : vector<16x128xf32>
    %61 = vector.extract_strided_slice %60 {offsets = [8, 0], sizes = [8, 128], strides = [1, 1]} : vector<16x128xf32> to vector<8x128xf32>
    %62 = vector.extract_strided_slice %60 {offsets = [0, 0], sizes = [8, 128], strides = [1, 1]} : vector<16x128xf32> to vector<8x128xf32>
    %63 = arith.subf %61, %62 : vector<8x128xf32>
    %64 = math.absf %63 : vector<8x128xf32>
    %cst_41 = arith.constant dense<0.000000e+00> : vector<128xf32>
    %65 = vector.multi_reduction <add>, %64, %cst_41 [0] : vector<8x128xf32> to vector<128xf32>
    %66 = vector.shape_cast %65 : vector<128xf32> to vector<1x128xf32>
    %cst_42 = arith.constant 1.46484381E-4 : f32
    %67 = vector.broadcast %cst_42 : f32 to vector<1x128xf32>
    %68 = arith.mulf %67, %66 : vector<1x128xf32>
    %69 = arith.addf %35, %68 : vector<1x128xf32>
    %70 = arith.truncf %60 : vector<16x128xf32> to vector<16x128xbf16>
    %c0_43 = arith.constant 0 : index
    %c0_44 = arith.constant 0 : index
    %71 = vector.load %arg9[%c0_43, %c0_44] : memref<24x16xbf16, #tpu.memory_space<vmem>>, vector<24x16xbf16>
    %cst_45 = arith.constant dense<0.000000e+00> : vector<24x128xf32>
    %72 = tpu.matmul %71, %70, %cst_45 {dimension_numbers = #tpu.dot_dimension_numbers<[1], [0], [0], [1], [0, 0, 1, 1], [], []>} : vector<24x16xbf16>, vector<16x128xbf16>, vector<24x128xf32> -> vector<24x128xf32>
    %73 = arith.truncf %72 : vector<24x128xf32> to vector<24x128xbf16>
    %cst_46 = arith.constant 0.000000e+00 : f32
    %74 = vector.broadcast %cst_46 : f32 to vector<8x128xf32>
    %75 = vector.extract_strided_slice %73 {offsets = [0, 0], sizes = [8, 128], strides = [1, 1]} : vector<24x128xbf16> to vector<8x128xbf16>
    %c0_47 = arith.constant 0 : index
    %c0_48 = arith.constant 0 : index
    %c0_49 = arith.constant 0 : index
    %76 = vector.load %arg10[%c0_47, %c0_48, %c0_49] : memref<3x128x128xbf16, #tpu.memory_space<vmem>>, vector<1x128x128xbf16>
    %77 = vector.shape_cast %76 : vector<1x128x128xbf16> to vector<128x128xbf16>
    %cst_50 = arith.constant dense<0.000000e+00> : vector<8x128xf32>
    %78 = tpu.matmul %75, %77, %cst_50 {dimension_numbers = #tpu.dot_dimension_numbers<[1], [0], [0], [1], [0, 0, 1, 1], [], []>} : vector<8x128xbf16>, vector<128x128xbf16>, vector<8x128xf32> -> vector<8x128xf32>
    %79 = arith.addf %74, %78 : vector<8x128xf32>
    %80 = vector.extract_strided_slice %73 {offsets = [8, 0], sizes = [8, 128], strides = [1, 1]} : vector<24x128xbf16> to vector<8x128xbf16>
    %c1_51 = arith.constant 1 : index
    %c0_52 = arith.constant 0 : index
    %c0_53 = arith.constant 0 : index
    %81 = vector.load %arg10[%c1_51, %c0_52, %c0_53] : memref<3x128x128xbf16, #tpu.memory_space<vmem>>, vector<1x128x128xbf16>
    %82 = vector.shape_cast %81 : vector<1x128x128xbf16> to vector<128x128xbf16>
    %cst_54 = arith.constant dense<0.000000e+00> : vector<8x128xf32>
    %83 = tpu.matmul %80, %82, %cst_54 {dimension_numbers = #tpu.dot_dimension_numbers<[1], [0], [0], [1], [0, 0, 1, 1], [], []>} : vector<8x128xbf16>, vector<128x128xbf16>, vector<8x128xf32> -> vector<8x128xf32>
    %84 = arith.addf %79, %83 : vector<8x128xf32>
    %85 = vector.extract_strided_slice %73 {offsets = [16, 0], sizes = [8, 128], strides = [1, 1]} : vector<24x128xbf16> to vector<8x128xbf16>
    %c2_55 = arith.constant 2 : index
    %c0_56 = arith.constant 0 : index
    %c0_57 = arith.constant 0 : index
    %86 = vector.load %arg10[%c2_55, %c0_56, %c0_57] : memref<3x128x128xbf16, #tpu.memory_space<vmem>>, vector<1x128x128xbf16>
    %87 = vector.shape_cast %86 : vector<1x128x128xbf16> to vector<128x128xbf16>
    %cst_58 = arith.constant dense<0.000000e+00> : vector<8x128xf32>
    %88 = tpu.matmul %85, %87, %cst_58 {dimension_numbers = #tpu.dot_dimension_numbers<[1], [0], [0], [1], [0, 0, 1, 1], [], []>} : vector<8x128xbf16>, vector<128x128xbf16>, vector<8x128xf32> -> vector<8x128xf32>
    %89 = arith.addf %84, %88 : vector<8x128xf32>
    %c0_59 = arith.constant 0 : index
    %c0_60 = arith.constant 0 : index
    %90 = vector.load %arg11[%c0_59, %c0_60] : memref<1x128xf32, #tpu.memory_space<vmem>>, vector<1x128xf32>
    %91 = vector.broadcast %90 : vector<1x128xf32> to vector<8x128xf32>
    %92 = arith.addf %89, %91 : vector<8x128xf32>
    %cst_61 = arith.constant 0.000000e+00 : f32
    %93 = vector.broadcast %cst_61 : f32 to vector<8x128xf32>
    %94 = arith.maximumf %92, %93 : vector<8x128xf32>
    %95 = vector.extract_strided_slice %94 {offsets = [4, 0], sizes = [4, 128], strides = [1, 1]} : vector<8x128xf32> to vector<4x128xf32>
    %96 = vector.extract_strided_slice %94 {offsets = [0, 0], sizes = [4, 128], strides = [1, 1]} : vector<8x128xf32> to vector<4x128xf32>
    %97 = arith.subf %95, %96 : vector<4x128xf32>
    %98 = math.absf %97 : vector<4x128xf32>
    %cst_62 = arith.constant dense<0.000000e+00> : vector<128xf32>
    %99 = vector.multi_reduction <add>, %98, %cst_62 [0] : vector<4x128xf32> to vector<128xf32>
    %100 = vector.shape_cast %99 : vector<128xf32> to vector<1x128xf32>
    %cst_63 = arith.constant 1.95312503E-4 : f32
    %101 = vector.broadcast %cst_63 : f32 to vector<1x128xf32>
    %102 = arith.mulf %101, %100 : vector<1x128xf32>
    %103 = arith.addf %69, %102 : vector<1x128xf32>
    %c0_64 = arith.constant 0 : index
    %c0_65 = arith.constant 0 : index
    %c0_66 = arith.constant 0 : index
    %c0_67 = arith.constant 0 : index
    %104 = vector.load %arg12[%c0_64, %c0_65, %c0_66, %c0_67] : memref<1x1x1x128xf32, #tpu.memory_space<vmem>>, vector<1x1x1x128xf32>
    %105 = vector.shape_cast %104 : vector<1x1x1x128xf32> to vector<1x128xf32>
    %106 = vector.shape_cast %103 : vector<1x128xf32> to vector<1x1x1x128xf32>
    tpu.vector_store %arg12[%c0_64, %c0_65, %c0_66, %c0_67], %106 {strides = array<i32>} : memref<1x1x1x128xf32, #tpu.memory_space<vmem>>, vector<1x1x1x128xf32>,
    return
  }
  func.func @transform_0(%arg0: i32, %arg1: i32) -> (i32, i32, i32, i32) {
    %c0_i32 = arith.constant 0 : i32
    %c0_i32_0 = arith.constant 0 : i32
    %c0_i32_1 = arith.constant 0 : i32
    return %arg0, %arg1, %c0_i32, %c0_i32_0 : i32, i32, i32, i32
  }
  func.func @transform_1(%arg0: i32, %arg1: i32) -> (i32, i32) {
    %c0_i32 = arith.constant 0 : i32
    %c0_i32_0 = arith.constant 0 : i32
    %c0_i32_1 = arith.constant 0 : i32
    return %c0_i32, %c0_i32_0 : i32, i32
  }
  func.func @transform_2(%arg0: i32, %arg1: i32) -> (i32, i32, i32) {
    %c0_i32 = arith.constant 0 : i32
    %c0_i32_0 = arith.constant 0 : i32
    %c0_i32_1 = arith.constant 0 : i32
    %c0_i32_2 = arith.constant 0 : i32
    return %c0_i32, %c0_i32_0, %c0_i32_1 : i32, i32, i32
  }
  func.func @transform_3(%arg0: i32, %arg1: i32) -> (i32, i32) {
    %c0_i32 = arith.constant 0 : i32
    %c0_i32_0 = arith.constant 0 : i32
    %c0_i32_1 = arith.constant 0 : i32
    return %c0_i32, %c0_i32_0 : i32, i32
  }
  func.func @transform_4(%arg0: i32, %arg1: i32) -> (i32, i32) {
    %c0_i32 = arith.constant 0 : i32
    %c0_i32_0 = arith.constant 0 : i32
    %c0_i32_1 = arith.constant 0 : i32
    return %c0_i32, %c0_i32_0 : i32, i32
  }
  func.func @transform_5(%arg0: i32, %arg1: i32) -> (i32, i32, i32) {
    %c0_i32 = arith.constant 0 : i32
    %c0_i32_0 = arith.constant 0 : i32
    %c0_i32_1 = arith.constant 0 : i32
    %c0_i32_2 = arith.constant 0 : i32
    return %c0_i32, %c0_i32_0, %c0_i32_1 : i32, i32, i32
  }
  func.func @transform_6(%arg0: i32, %arg1: i32) -> (i32, i32) {
    %c0_i32 = arith.constant 0 : i32
    %c0_i32_0 = arith.constant 0 : i32
    %c0_i32_1 = arith.constant 0 : i32
    return %c0_i32, %c0_i32_0 : i32, i32
  }
  func.func @transform_7(%arg0: i32, %arg1: i32) -> (i32, i32) {
    %c0_i32 = arith.constant 0 : i32
    %c0_i32_0 = arith.constant 0 : i32
    %c0_i32_1 = arith.constant 0 : i32
    return %c0_i32, %c0_i32_0 : i32, i32
  }
  func.func @transform_8(%arg0: i32, %arg1: i32) -> (i32, i32, i32) {
    %c0_i32 = arith.constant 0 : i32
    %c0_i32_0 = arith.constant 0 : i32
    %c0_i32_1 = arith.constant 0 : i32
    %c0_i32_2 = arith.constant 0 : i32
    return %c0_i32, %c0_i32_0, %c0_i32_1 : i32, i32, i32
  }
  func.func @transform_9(%arg0: i32, %arg1: i32) -> (i32, i32) {
    %c0_i32 = arith.constant 0 : i32
    %c0_i32_0 = arith.constant 0 : i32
    %c0_i32_1 = arith.constant 0 : i32
    return %c0_i32, %c0_i32_0 : i32, i32
  }
  func.func @transform_10(%arg0: i32, %arg1: i32) -> (i32, i32, i32, i32) {
    %c0_i32 = arith.constant 0 : i32
    %c0_i32_0 = arith.constant 0 : i32
    %c0_i32_1 = arith.constant 0 : i32
    return %arg0, %arg1, %c0_i32, %c0_i32_0 : i32, i32, i32, i32
  }
}

</mosaic_0001>

<bundles_post_ra>
// kernel: tile.18
= control target key start
LH: loop header
LB: loop body
LE: loop exit
PB: predicated region body
PF: predicated region fallthrough
CT: control target
= control target key end

     0   :  { %s28_s0 = inlined_call_operand.vmem [shape: f32[8], index: 0, kind: input, shape index: {}]   ;;  %s29_s1 = inlined_call_operand.vmem [shape: f32[16,8], index: 1, kind: output, shape index: {}]  }
   0x1   :  { %v4_v0 = vld [vmem:[%s28_s0] ss:$0 sm:$0xff] }
   0x2   :  { %5 = vst [vmem:[%s29_s1] sm:$0xff] %v4_v0 }
   0x3   :  { %8 = vst [vmem:[%s29_s1 + $0x8] sm:$0xff] %v4_v0 }

// kernel: tile.19
= control target key start
LH: loop header
LB: loop body
LE: loop exit
PB: predicated region body
PF: predicated region fallthrough
CT: control target
= control target key end

     0   :  { %s131_s10 = smov 120   ;;  %s132_s11 = smov 104   ;;  %vm3_vm0 = vcmask 64512   ;;  %vm9_vm1 = vcmask 1048512   ;;  %vm15_vm2 = vcmask 982912   ;;  %vm21_vm3 = vcmask 917312   ;;  %s207_s0 = inlined_call_operand.vmem [shape: f32[16,8], index: 0, kind: input, shape index: {}]   ;;  %s208_s1 = inlined_call_operand.vmem [shape: f32[1,128], index: 1, kind: output, shape index: {}]  }
   0x1   :  { %v101_v0 = vld [vmem:[%s207_s0 + $0xf] sm:$0x1]   ;;  %v103_v1 = vld [vmem:[%s207_s0 + $0xd] sm:$0x1]   ;;  %v105_v2 = vld [vmem:[%s207_s0 + $0xb] sm:$0x1]  }
   0x2   :  { %7 = vrot.lane.b32.xlu0 %v101_v0, %s131_s10  ;;  %19 = vrot.lane.b32.xlu1 %v103_v1, %s132_s11  ;;  %s133_s14 = smov 88   ;;  %v102_v3 = vld [vmem:[%s207_s0 + $0xe] sm:$0x1]   ;;  %v104_v4 = vld [vmem:[%s207_s0 + $0xc] sm:$0x1]   ;;  %s134_s19 = smov 112  }
   0x3   :  { %31 = vrot.lane.b32.xlu2 %v105_v2, %s133_s14  ;;  %s135_s20 = smov 96   ;;  %v106_v5 = vld [vmem:[%s207_s0 + $0xa] sm:$0x1]   ;;  %s136_s23 = smov 80   ;;  %v107_v6 = vld [vmem:[%s207_s0 + $0x9] sm:$0x1]  }
   0x4   :  { %v108_v7 = vld [vmem:[%s207_s0 + $0x8] sm:$0x1]   ;;  %s137_s28 = smov 72   ;;  %s138_s29 = smov 64   ;;  %v109_v8 = vld [vmem:[%s207_s0 + $0x7] sm:$0x1]  }
   0x5   :  { %s139_s3 = smov 56   ;;  %v110_v9 = vld [vmem:[%s207_s0 + $0x6] sm:$0x1]   ;;  %v111_v10 = vld [vmem:[%s207_s0 + $0x5] sm:$0x1]   ;;  %s140_s8 = smov 48  }
   0x6   :  { %s141_s9 = smov 40   ;;  %v112_v11 = vld [vmem:[%s207_s0 + $0x4] sm:$0x1]   ;;  %s142_s12 = smov 32   ;;  %v113_v12 = vld [vmem:[%s207_s0 + $0x3] sm:$0x1]  }
   0x7   :  { %v114_v13 = vld [vmem:[%s207_s0 + $0x2] sm:$0x1]   ;;  %s143_s17 = smov 24   ;;  %s144_s18 = smov 16   ;;  %v115_v14 = vld [vmem:[%s207_s0 + $0x1] sm:$0x1]  }
   0x8   :  { %s145_s21 = smov 8   ;;  %v2_v15 = vld [vmem:[%s207_s0] sm:$0x1]   ;;  %vm27_vm4 = vcmask 851712   ;;  %vm33_vm5 = vcmask 786112   ;;  %vm39_vm6 = vcmask 720512  }
   0x9   :  { %4 = vst.msk [vmem:[#allocation0] sm:$0x1] %vm3_vm0, %v2_v15   ;;  %vm45_vm7 = vcmask 654912   ;;  %vm51_vm8 = vcmask 589312   ;;  %vm57_vm9 = vcmask 523712   ;;  %vm63_vm10 = vcmask 458112  }
   0xa   :  { %13 = vrot.lane.b32.xlu0 %v102_v3, %s134_s19  ;;  %25 = vrot.lane.b32.xlu1 %v104_v4, %s135_s20  ;;  %vm69_vm11 = vcmask 392512   ;;  %vm75_vm12 = vcmask 326912   ;;  %vm81_vm13 = vcmask 261312   ;;  %vm87_vm14 = vcmask 195712  }
   0xb   :  { %37 = vrot.lane.b32.xlu2 %v106_v5, %s136_s23  ;;  %vm93_vm15 = vcmask 130112  }
  0x12   :  { %43 = vrot.lane.b32.xlu0 %v107_v6, %s137_s28  ;;  %49 = vrot.lane.b32.xlu1 %v108_v7, %s138_s29 }
  0x13   :  { %55 = vrot.lane.b32.xlu2 %v109_v8, %s139_s3 }
  0x1a   :  { %61 = vrot.lane.b32.xlu0 %v110_v9, %s140_s8  ;;  %67 = vrot.lane.b32.xlu1 %v111_v10, %s141_s9 }
  0x1b   :  { %73 = vrot.lane.b32.xlu2 %v112_v11, %s142_s12 }
  0x22   :  { %79 = vrot.lane.b32.xlu0 %v113_v12, %s143_s17  ;;  %85 = vrot.lane.b32.xlu1 %v114_v13, %s144_s18 }
  0x23   :  { %91 = vrot.lane.b32.xlu2 %v115_v14, %s145_s21 }
  0x5d   :  { %v32_v16 = vpop.permute.xlu2 %31  }
  0x65   :  { %v38_v17 = vpop.permute.xlu2 %37  }
  0x6d   :  { %v56_v18 = vpop.permute.xlu2 %55  }
  0x74   :  { %v8_v19 = vpop.permute.xlu0 %7   ;;  %v20_v20 = vpop.permute.xlu1 %19  }
  0x75   :  { %10 = vst.msk [vmem:[#allocation0] sm:$0x1] %vm9_vm1, %v8_v19   ;;  %v74_v21 = vpop.permute.xlu2 %73  }
  0x7c   :  { %v14_v22 = vpop.permute.xlu0 %13   ;;  %v26_v23 = vpop.permute.xlu1 %25  }
  0x7d   :  { %16 = vst.msk [vmem:[#allocation0] sm:$0x1] %vm15_vm2, %v14_v22   ;;  %v92_v24 = vpop.permute.xlu2 %91  }
  0x7e   :  { %22 = vst.msk [vmem:[#allocation0] sm:$0x1] %vm21_vm3, %v20_v20  }
  0x7f   :  { %28 = vst.msk [vmem:[#allocation0] sm:$0x1] %vm27_vm4, %v26_v23  }
  0x80   :  { %34 = vst.msk [vmem:[#allocation0] sm:$0x1] %vm33_vm5, %v32_v16  }
  0x81   :  { %40 = vst.msk [vmem:[#allocation0] sm:$0x1] %vm39_vm6, %v38_v17  }
  0x84   :  { %v44_v25 = vpop.permute.xlu0 %43   ;;  %v50_v26 = vpop.permute.xlu1 %49  }
  0x85   :  { %46 = vst.msk [vmem:[#allocation0] sm:$0x1] %vm45_vm7, %v44_v25  }
  0x86   :  { %52 = vst.msk [vmem:[#allocation0] sm:$0x1] %vm51_vm8, %v50_v26  }
  0x87   :  { %58 = vst.msk [vmem:[#allocation0] sm:$0x1] %vm57_vm9, %v56_v18  }
  0x8c   :  { %v62_v27 = vpop.permute.xlu0 %61   ;;  %v68_v28 = vpop.permute.xlu1 %67  }
  0x8d   :  { %64 = vst.msk [vmem:[#allocation0] sm:$0x1] %vm63_vm10, %v62_v27  }
  0x8e   :  { %70 = vst.msk [vmem:[#allocation0] sm:$0x1] %vm69_vm11, %v68_v28  }
  0x8f   :  { %76 = vst.msk [vmem:[#allocation0] sm:$0x1] %vm75_vm12, %v74_v21  }
  0x94   :  { %v80_v29 = vpop.permute.xlu0 %79   ;;  %v86_v30 = vpop.permute.xlu1 %85  }
  0x95   :  { %82 = vst.msk [vmem:[#allocation0] sm:$0x1] %vm81_vm13, %v80_v29  }
  0x96   :  { %88 = vst.msk [vmem:[#allocation0] sm:$0x1] %vm87_vm14, %v86_v30  }
  0x97   :  { %94 = vst.msk [vmem:[#allocation0] sm:$0x1] %vm93_vm15, %v92_v24  }
  0x9e   :  { %v97_v31 = vld [vmem:[#allocation0] sm:$0x1] }
  0x9f   :  { %100 = vst [vmem:[%s208_s1] sm:$0x1] %v97_v31 }

// kernel: tile.23
= control target key start
LH: loop header
LB: loop body
LE: loop exit
PB: predicated region body
PF: predicated region fallthrough
CT: control target
= control target key end

     0   :  { %s22_s0 = inlined_call_operand.vmem [shape: f32[16], index: 0, kind: input, shape index: {}]   ;;  %s23_s1 = inlined_call_operand.vmem [shape: f32[8,16], index: 1, kind: output, shape index: {}]  }
   0x1   :  { %v4_v0 = vld [vmem:[%s22_s0] ss:$0 sm:$0xff] }
   0x2   :  { %5 = vst [vmem:[%s23_s1] sm:$0xff] %v4_v0 }

// kernel: tile.24
= control target key start
LH: loop header
LB: loop body
LE: loop exit
PB: predicated region body
PF: predicated region fallthrough
CT: control target
= control target key end

     0   :  { %s67_s10 = smov 112   ;;  %s68_s11 = smov 80   ;;  %vm3_vm0 = vcmask 130048   ;;  %vm9_vm1 = vcmask 1048448   ;;  %vm15_vm2 = vcmask 917248   ;;  %vm21_vm3 = vcmask 786048   ;;  %s111_s0 = inlined_call_operand.vmem [shape: f32[8,16], index: 0, kind: input, shape index: {}]   ;;  %s112_s1 = inlined_call_operand.vmem [shape: f32[1,128], index: 1, kind: output, shape index: {}]  }
   0x1   :  { %v53_v0 = vld [vmem:[%s111_s0 + $0x7] sm:$0x1]   ;;  %v55_v1 = vld [vmem:[%s111_s0 + $0x5] sm:$0x1]   ;;  %v57_v2 = vld [vmem:[%s111_s0 + $0x3] sm:$0x1]  }
   0x2   :  { %7 = vrot.lane.b32.xlu0 %v53_v0, %s67_s10  ;;  %19 = vrot.lane.b32.xlu1 %v55_v1, %s68_s11  ;;  %s69_s14 = smov 48   ;;  %v54_v3 = vld [vmem:[%s111_s0 + $0x6] sm:$0x1]   ;;  %v56_v4 = vld [vmem:[%s111_s0 + $0x4] sm:$0x1]   ;;  %s70_s21 = smov 96  }
   0x3   :  { %31 = vrot.lane.b32.xlu2 %v57_v2, %s69_s14  ;;  %v58_v5 = vld [vmem:[%s111_s0 + $0x2] sm:$0x1]   ;;  %s71_s22 = smov 64   ;;  %s72_s23 = smov 32   ;;  %v59_v6 = vld [vmem:[%s111_s0 + $0x1] sm:$0x1]  }
   0x4   :  { %s73_s26 = smov 16   ;;  %v2_v7 = vld [vmem:[%s111_s0] sm:$0x1]   ;;  %vm27_vm4 = vcmask 654848   ;;  %vm33_vm5 = vcmask 523648   ;;  %vm39_vm6 = vcmask 392448  }
   0x5   :  { %4 = vst.msk [vmem:[#allocation0] sm:$0x1] %vm3_vm0, %v2_v7   ;;  %vm45_vm7 = vcmask 261248  }
   0xa   :  { %13 = vrot.lane.b32.xlu0 %v54_v3, %s70_s21  ;;  %25 = vrot.lane.b32.xlu1 %v56_v4, %s71_s22 }
   0xb   :  { %37 = vrot.lane.b32.xlu2 %v58_v5, %s72_s23 }
  0x12   :  { %43 = vrot.lane.b32.xlu0 %v59_v6, %s73_s26 }
  0x5d   :  { %v32_v8 = vpop.permute.xlu2 %31  }
  0x65   :  { %v38_v9 = vpop.permute.xlu2 %37  }
  0x74   :  { %v8_v10 = vpop.permute.xlu0 %7   ;;  %v20_v11 = vpop.permute.xlu1 %19  }
  0x75   :  { %10 = vst.msk [vmem:[#allocation0] sm:$0x1] %vm9_vm1, %v8_v10  }
  0x7c   :  { %v14_v12 = vpop.permute.xlu0 %13   ;;  %v26_v13 = vpop.permute.xlu1 %25  }
  0x7d   :  { %16 = vst.msk [vmem:[#allocation0] sm:$0x1] %vm15_vm2, %v14_v12  }
  0x7e   :  { %22 = vst.msk [vmem:[#allocation0] sm:$0x1] %vm21_vm3, %v20_v11  }
  0x7f   :  { %28 = vst.msk [vmem:[#allocation0] sm:$0x1] %vm27_vm4, %v26_v13  }
  0x80   :  { %34 = vst.msk [vmem:[#allocation0] sm:$0x1] %vm33_vm5, %v32_v8  }
  0x81   :  { %40 = vst.msk [vmem:[#allocation0] sm:$0x1] %vm39_vm6, %v38_v9  }
  0x84   :  { %v44_v14 = vpop.permute.xlu0 %43  }
  0x85   :  { %46 = vst.msk [vmem:[#allocation0] sm:$0x1] %vm45_vm7, %v44_v14  }
  0x8c   :  { %v49_v15 = vld [vmem:[#allocation0] sm:$0x1] }
  0x8d   :  { %52 = vst [vmem:[%s112_s1] sm:$0x1] %v49_v15 }

// kernel: tile.28
= control target key start
LH: loop header
LB: loop body
LE: loop exit
PB: predicated region body
PF: predicated region fallthrough
CT: control target
= control target key end

     0   :  { %s22_s0 = inlined_call_operand.vmem [shape: f32[32], index: 0, kind: input, shape index: {}]   ;;  %s23_s1 = inlined_call_operand.vmem [shape: f32[4,32], index: 1, kind: output, shape index: {}]  }
   0x1   :  { %v4_v0 = vld [vmem:[%s22_s0] ss:$0 sm:$0xff] }
   0x2   :  { %5 = vst [vmem:[%s23_s1] sm:$0xf] %v4_v0 }

// kernel: tile.29
= control target key start
LH: loop header
LB: loop body
LE: loop exit
PB: predicated region body
PF: predicated region fallthrough
CT: control target
= control target key end

     0   :  { %s37_s8 = smov 32   ;;  %s38_s9 = smov 64   ;;  %vm7_vm0 = vcmask 261120   ;;  %vm13_vm1 = vcmask 1048320   ;;  %vm19_vm2 = vcmask 785920   ;;  %vm25_vm3 = vcmask 523520   ;;  %s55_s0 = inlined_call_operand.vmem [shape: f32[4,32], index: 0, kind: input, shape index: {}]   ;;  %s56_s1 = inlined_call_operand.vmem [shape: f32[1,128], index: 1, kind: output, shape index: {}]  }
   0x1   :  { %v4_v0 = vld [vmem:[%s55_s0] sm:$0xf]  ;;  %s36_s0 = smov 96  }
   0x2   :  { %5 = vst [vmem:[#allocation1] sm:$0xf] %v4_v0 }
   0x9   :  { %v10_v1 = vld [vmem:[#allocation1 + $0x3] sm:$0x1]   ;;  %v22_v2 = vld [vmem:[#allocation1 + $0x1] sm:$0x1]   ;;  %v16_v3 = vld [vmem:[#allocation1 + $0x2] sm:$0x1]  }
   0xa   :  { %11 = vrot.lane.b32.xlu0 %v10_v1, %s36_s0  ;;  %23 = vrot.lane.b32.xlu1 %v22_v2, %s37_s8  ;;  %v6_v4 = vld [vmem:[#allocation1] sm:$0x1]  }
   0xb   :  { %8 = vst.msk [vmem:[#allocation0] sm:$0x1] %vm7_vm0, %v6_v4  }
  0x12   :  { %17 = vrot.lane.b32.xlu0 %v16_v3, %s38_s9 }
  0x7c   :  { %v12_v5 = vpop.permute.xlu0 %11   ;;  %v24_v6 = vpop.permute.xlu1 %23  }
  0x7d   :  { %14 = vst.msk [vmem:[#allocation0] sm:$0x1] %vm13_vm1, %v12_v5  }
  0x84   :  { %v18_v7 = vpop.permute.xlu0 %17  }
  0x85   :  { %20 = vst.msk [vmem:[#allocation0] sm:$0x1] %vm19_vm2, %v18_v7  }
  0x86   :  { %26 = vst.msk [vmem:[#allocation0] sm:$0x1] %vm25_vm3, %v24_v6  }
  0x8d   :  { %v29_v8 = vld [vmem:[#allocation0] sm:$0x1] }
  0x8e   :  { %32 = vst [vmem:[%s56_s1] sm:$0x1] %v29_v8 }

// kernel: structural_loss.1
= control target key start
LH: loop header
LB: loop body
LE: loop exit
PB: predicated region body
PF: predicated region fallthrough
CT: control target
= control target key end

     0   :  { %s2078_s13 = smov 0   ;;  %s2080_s14 = smov 0   ;;  %s2375_s0 = inlined_call_operand.vmem [shape: bf16[2,2,32,64], index: 0, kind: input, shape index: {}]   ;;  %s2376_s1 = inlined_call_operand.vmem [shape: bf16[96,32], index: 1, kind: input, shape index: {}]   ;;  %s2377_s2 = inlined_call_operand.vmem [shape: bf16[3,64,128], index: 2, kind: input, shape index: {}]   ;;  %s2378_s3 = inlined_call_operand.vmem [shape: f32[1,128], index: 3, kind: input, shape index: {}]   ;;  %s2379_s4 = inlined_call_operand.vmem [shape: bf16[48,32], index: 4, kind: input, shape index: {}]   ;;  %s2380_s5 = inlined_call_operand.vmem [shape: bf16[3,128,128], index: 5, kind: input, shape index: {}]   ;;  %s2381_s6 = inlined_call_operand.vmem [shape: f32[1,128], index: 6, kind: input, shape index: {}]   ;;  %s2382_s7 = inlined_call_operand.vmem [shape: bf16[24,16], index: 7, kind: input, shape index: {}]   ;;  %s2383_s8 = inlined_call_operand.vmem [shape: bf16[3,128,128], index: 8, kind: input, shape index: {}]   ;;  %s2384_s9 = inlined_call_operand.vmem [shape: f32[1,128], index: 9, kind: input, shape index: {}]   ;;  %s2385_s10 = inlined_call_operand.vmem [shape: f32[2,2,1,128], index: 10, kind: output, shape index: {}]  }
   0x1   :  { %s2082_s15 = smov 0   ;;  %s2084_s16 = smov 0  }
   0x2   :  { %s2086_s17 = smov 0  }
   0x3 LB: > { %s29_s18 = sadd.s32 1, %s2013_s15  ;;  %s32_s19 = sadd.s32 1, %s2017_s16  ;;  %s2021_s17 = sphi %s2086_s17, %s20_s17   ;;  %s2017_s16 = sphi %s2084_s16, %s2389_s16   ;;  %s2013_s15 = sphi %s2082_s15, %s2388_s15   ;;  %s2009_s14 = sphi %s2080_s14, %s2387_s14   ;;  %s2005_s13 = sphi %s2078_s13, %s2386_s13  }
   0x4   : > { %p30_p0 = scmp.ge.s32.totalorder %s29_s18, 2  ;;  %p1476_p1 = scmp.ge.s32.totalorder %s2021_s17, 1 }
   0x5   : > { %p332_p2 = scmp.lt.s32.totalorder %s2021_s17, 5 }
   0x6   : > { %s2391_s18 = smov (%p30_p0, %s29_s18), 0  ;;  %s2393_s19 = smov (!%p30_p0, %s32_s19), %s2017_s16 }
   0x7   : > { %p333_p3 = pnand %p1476_p1, %p332_p2  ;;  %p34_p4 = scmp.ge.s32.totalorder %s2393_s19, 2 }
   0x8   : > { %p376_p5 = scmp.lt.s32.totalorder (!%p333_p3), %s2009_s14, 1  ;;  %p378_p6 = scmp.lt.s32.totalorder (!%p333_p3), %s2005_s13, 1 }
   0x9   : > { %s2395_s19 = smov (%p34_p4, %s2393_s19), 0  ;;  %336 = sbr.rel (%p333_p3) target bundleno = 1034 (0x40a), region = 60 }
   0xe   : > { %s2397_s14 = smov (!%p376_p5, %s2009_s14), 1  ;;  %s2399_s13 = smov (!%p378_p6, %s2005_s13), 1  ;;  %v1870_v2 = vld [vmem:[%s2376_s1] sm:$0xff]  ;;  %vm451_vm0 = vcmask 261120   ;;  %v1871_v3 = vld [vmem:[%s2376_s1 + $0x8] sm:$0xff]  ;;  %v1872_v4 = vld [vmem:[%s2376_s1 + $0x10] sm:$0xff] }
   0xf   : > { %s1478_s20 = sshll.u32 %s2397_s14, 3  ;;  %s1480_s21 = sshll.u32 %s2397_s14, 1  ;;  %v1873_v5 = vld [vmem:[%s2376_s1 + $0x18] sm:$0xff]  ;;  %v1874_v6 = vld [vmem:[%s2376_s1 + $0x20] sm:$0xff]  ;;  %v1875_v7 = vld [vmem:[%s2376_s1 + $0x28] sm:$0xff]  ;;  %vm572_vm1 = vcmask 523264  }
  0x10   : > { %s1477_s22 = sshll.u32 %s2399_s13, 2  ;;  %s2108_s23 = sadd.s32 %s1480_s21, %s2399_s13  ;;  %v1879_v8 = vld [vmem:[%s2377_s2 + $0x18] sm:$0xff]  ;;  %v1878_v9 = vld [vmem:[%s2377_s2 + $0x10] sm:$0xff]  ;;  %v1877_v10 = vld [vmem:[%s2377_s2 + $0x8] sm:$0xff]  ;;  %vm1102_vm2 = vcmask 130048   ;;  %vm1378_vm3 = vcmask 1043456  }
  0x11   : > { %s382_s24 = sadd.s32 %s1478_s20, %s1477_s22  ;;  %642 = vmatpush.bf16.msra.mxu2 %v1879_v8  ;;  %v1876_v11 = vld [vmem:[%s2377_s2] sm:$0xff]  ;;  %v1883_v12 = vld [vmem:[%s2377_s2 + $0x38] sm:$0xff]  ;;  %v1882_v14 = vld [vmem:[%s2377_s2 + $0x30] sm:$0xff] }
  0x12   : > { %s1479_s25 = sshll.u32 %s382_s24, 2  ;;  %583 = vmatpush.bf16.msra.mxu1 %v1883_v12  ;;  %v1881_v15 = vld [vmem:[%s2377_s2 + $0x28] sm:$0xff]  ;;  %v1880_v19 = vld [vmem:[%s2377_s2 + $0x20] sm:$0xff]  ;;  %v1887_v30 = vld [vmem:[%s2377_s2 + $0x58] sm:$0xff] }
  0x13   : > { %s384_s28 = scalar_lea.vmem %s2375_s0, %s1479_s25  ;;  %710 = vmatpush.bf16.msra.mxu3 %v1887_v30  ;;  %v1886_v32 = vld [vmem:[%s2377_s2 + $0x50] sm:$0xff]  ;;  %v1885_v33 = vld [vmem:[%s2377_s2 + $0x48] sm:$0xff]  ;;  %v1884_v37 = vld [vmem:[%s2377_s2 + $0x40] sm:$0xff]  ;;  %s391_s25 = scalar_lea.vmem %s2385_s10, %s2108_s23 }
  0x14   : > { %v1869_v0 = vld [vmem:[%s384_s28 + $0x8] sm:$0xff]  ;;  %v1868_v1 = vld [vmem:[%s384_s28] sm:$0xff] }
  0x15   : > { %476 = vmatpush.bf16.msra.mxu0 %v1869_v0  ;;  %643 = vmatpush.bf16.msra.mxu2 %v1878_v9  ;;  %v1980_v8 = vld [vmem:[%s2378_s3] ss:$0 sm:$0xff] }
  0x16   : > { %584 = vmatpush.bf16.msra.mxu1 %v1882_v14 }
  0x17   : > { %711 = vmatpush.bf16.msra.mxu3 %v1886_v32 }
  0x19   : > { %477 = vmatpush.bf16.msra.mxu0 %v1868_v1  ;;  %644 = vmatpush.bf16.msra.mxu2 %v1877_v10 }
  0x1a   : > { %585 = vmatpush.bf16.msra.mxu1 %v1881_v15 }
  0x1b   : > { %712 = vmatpush.bf16.msra.mxu3 %v1885_v33 }
  0x1c   : > { %1513 = vmatmul.msk.bf16.vlgmr.msra.gmra.mxu0 %vm451_vm0, %v1870_v2 }
  0x1d   : > { %645 = vmatpush.bf16.msra.mxu2 %v1876_v11 }
  0x1e   : > { %586 = vmatpush.bf16.msra.mxu1 %v1880_v19 }
  0x1f   : > { %713 = vmatpush.bf16.msra.mxu3 %v1884_v37  ;;  %v1897_v37 = vld [vmem:[%s2380_s5 + $0x30] sm:$0xff] }
  0x2c   : > { %1514 = vmatmul.msk.bf16.gmra.mxu0 %vm451_vm0, %v1871_v3 }
  0x3c   : > { %1515 = vmatmul.msk.bf16.gmra.mxu0 %vm451_vm0, %v1872_v4 }
  0x4c   : > { %1516 = vmatmul.msk.bf16.gmra.mxu0 %vm451_vm0, %v1873_v5 }
  0x5c   : > { %1517 = vmatmul.msk.bf16.gmra.mxu0 %vm451_vm0, %v1874_v6 }
  0x6c   : > { %1518 = vmatmul.msk.bf16.gmra.mxu0 %vm451_vm0, %v1875_v7 }
  0x99   : > { %v479_v13 = vpop.f32.mrf.mxu0 }
  0x9a   : > { %v509_v16 = vpack.c.bf16 %v479_v13, %v479_v13 }
  0x9c   : > { %v602_v20 = vunpack.c.l.b16 %v509_v16 }
  0xa1   : > { %v481_v17 = vpop.f32.mrf.mxu0 }
  0xa2   : > { %v510_v18 = vpack.c.bf16 %v481_v17, %v481_v17 }
  0xa4   : > { %v603_v21 = vunpack.c.l.b16 %v510_v18 }
  0xa6   : > { %v606_v22 = vpack.c.b16 %v603_v21, %v602_v20 }
  0xa8   : > { %1561 = vmatmul.msk.bf16.vlgmr.msra.gmra.mxu2 %vm572_vm1, %v606_v22 }
  0xa9   : > { %v484_v23 = vpop.f32.mrf.mxu0 }
  0xaa   : > { %v511_v24 = vpack.c.bf16 %v484_v23, %v484_v23 }
  0xac   : > { %v604_v27 = vunpack.c.l.b16 %v511_v24 }
  0xb1   : > { %v486_v25 = vpop.f32.mrf.mxu0 }
  0xb2   : > { %v512_v26 = vpack.c.bf16 %v486_v25, %v486_v25 }
  0xb4   : > { %v605_v28 = vunpack.c.l.b16 %v512_v26 }
  0xb6   : > { %v607_v29 = vpack.c.b16 %v605_v28, %v604_v27 }
  0xb8   : > { %1562 = vmatmul.msk.bf16.gmra.mxu2 %vm572_vm1, %v607_v29 }
  0xb9   : > { %v489_v31 = vpop.f32.mrf.mxu0 }
  0xba   : > { %v513_v34 = vpack.c.bf16 %v489_v31, %v489_v31 }
  0xbc   : > { %v542_v38 = vunpack.c.l.b16 %v513_v34  ;;  %v1888_v34 = vld [vmem:[%s2379_s4] sm:$0xff] }
  0xc1   : > { %v491_v35 = vpop.f32.mrf.mxu0 }
  0xc2   : > { %v514_v36 = vpack.c.bf16 %v491_v35, %v491_v35  ;;  %v1898_v35 = vld [vmem:[%s2380_s5 + $0x38] sm:$0xff] }
  0xc3   : > { %971 = vmatpush.bf16.msrb.mxu3 %v1898_v35 }
  0xc4   : > { %v543_v39 = vunpack.c.l.b16 %v514_v36  ;;  %v1906_v36 = vld [vmem:[%s2380_s5 + $0x78] sm:$0xff] }
  0xc5   : > { %903 = vmatpush.bf16.msrb.mxu2 %v1906_v36  ;;  %v1937_v36 = vld [vmem:[%s2383_s8 + $0xa8] sm:$0xff] }
  0xc6   : > { %v546_v40 = vpack.c.b16 %v543_v39, %v542_v38  ;;  %v1905_v38 = vld [vmem:[%s2380_s5 + $0x70] sm:$0xff]  ;;  %v1896_v39 = vld [vmem:[%s2380_s5 + $0x28] sm:$0xff] }
  0xc7   : > { %972 = vmatpush.bf16.msrb.mxu3 %v1897_v37 }
  0xc8   : > { %1543 = vmatmul.msk.bf16.vlgmr.msra.gmra.mxu1 %vm572_vm1, %v546_v40  ;;  %v1904_v40 = vld [vmem:[%s2380_s5 + $0x68] sm:$0xff] }
  0xc9   : > { %v494_v41 = vpop.f32.mrf.mxu0  ;;  %904 = vmatpush.bf16.msrb.mxu2 %v1905_v38 }
  0xca   : > { %v515_v42 = vpack.c.bf16 %v494_v41, %v494_v41  ;;  %v1895_v41 = vld [vmem:[%s2380_s5 + $0x20] sm:$0xff] }
  0xcb   : > { %973 = vmatpush.bf16.msrb.mxu3 %v1896_v39  ;;  %v1929_v39 = vld [vmem:[%s2383_s8 + $0x68] sm:$0xff] }
  0xcc   : > { %v544_v45 = vunpack.c.l.b16 %v515_v42  ;;  %v1903_v42 = vld [vmem:[%s2380_s5 + $0x60] sm:$0xff] }
  0xcd   : > { %905 = vmatpush.bf16.msrb.mxu2 %v1904_v40 }
  0xcf   : > { %974 = vmatpush.bf16.msrb.mxu3 %v1895_v41 }
  0xd1   : > { %v496_v43 = vpop.f32.mrf.mxu0  ;;  %906 = vmatpush.bf16.msrb.mxu2 %v1903_v42  ;;  %v1923_v42 = vld [vmem:[%s2383_s8 + $0x38] sm:$0xff] }
  0xd2   : > { %v516_v44 = vpack.c.bf16 %v496_v43, %v496_v43  ;;  %v1889_v43 = vld [vmem:[%s2379_s4 + $0x8] sm:$0xff] }
  0xd4   : > { %v545_v46 = vunpack.c.l.b16 %v516_v44  ;;  %v1890_v44 = vld [vmem:[%s2379_s4 + $0x10] sm:$0xff] }
  0xd6   : > { %v547_v47 = vpack.c.b16 %v545_v46, %v544_v45  ;;  %v1894_v45 = vld [vmem:[%s2380_s5 + $0x18] sm:$0xff] }
  0xd7   : > { %975 = vmatpush.bf16.msrb.mxu3 %v1894_v45  ;;  %v1902_v46 = vld [vmem:[%s2380_s5 + $0x58] sm:$0xff] }
  0xd8   : > { %1544 = vmatmul.msk.bf16.gmra.mxu1 %vm572_vm1, %v547_v47  ;;  %v1893_v47 = vld [vmem:[%s2380_s5 + $0x10] sm:$0xff]  ;;  %907 = vmatpush.bf16.msrb.mxu2 %v1902_v46  ;;  %v1915_v46 = vld [vmem:[%s2382_s7] sm:$0xff] }
  0xd9   : > { %v499_v48 = vpop.f32.mrf.mxu0 }
  0xda   : > { %v517_v49 = vpack.c.bf16 %v499_v48, %v499_v48  ;;  %v1901_v48 = vld [vmem:[%s2380_s5 + $0x50] sm:$0xff] }
  0xdb   : > { %976 = vmatpush.bf16.msrb.mxu3 %v1893_v47  ;;  %v1928_v47 = vld [vmem:[%s2383_s8 + $0x60] sm:$0xff] }
  0xdc   : > { %v670_v52 = vunpack.c.l.b16 %v517_v49  ;;  %v1892_v49 = vld [vmem:[%s2380_s5 + $0x8] sm:$0xff]  ;;  %908 = vmatpush.bf16.msrb.mxu2 %v1901_v48 }
  0xdf   : > { %977 = vmatpush.bf16.msrb.mxu3 %v1892_v49  ;;  %v1922_v49 = vld [vmem:[%s2383_s8 + $0x30] sm:$0xff] }
  0xe1   : > { %v501_v50 = vpop.f32.mrf.mxu0 }
  0xe2   : > { %v518_v51 = vpack.c.bf16 %v501_v50, %v501_v50  ;;  %v1900_v50 = vld [vmem:[%s2380_s5 + $0x48] sm:$0xff] }
  0xe3   : > { %909 = vmatpush.bf16.msrb.mxu2 %v1900_v50  ;;  %v1935_v50 = vld [vmem:[%s2383_s8 + $0x98] sm:$0xff] }
  0xe4   : > { %v671_v53 = vunpack.c.l.b16 %v518_v51  ;;  %v1891_v51 = vld [vmem:[%s2380_s5] sm:$0xff] }
  0xe5   : > { %978 = vmatpush.bf16.msrb.mxu3 %v1891_v51 }
  0xe6   : > { %v674_v54 = vpack.c.b16 %v671_v53, %v670_v52  ;;  %v1899_v52 = vld [vmem:[%s2380_s5 + $0x40] sm:$0xff]  ;;  %v1914_v53 = vld [vmem:[%s2380_s5 + $0xb8] sm:$0xff] }
  0xe7   : > { %910 = vmatpush.bf16.msrb.mxu2 %v1899_v52 }
  0xe8   : > { %1587 = vmatmul.msk.bf16.vlgmr.msra.gmra.mxu3 %vm572_vm1, %v674_v54  ;;  %v1913_v54 = vld [vmem:[%s2380_s5 + $0xb0] sm:$0xff] }
  0xe9   : > { %v504_v55 = vpop.f32.mrf.mxu0 }
  0xea   : > { %v519_v56 = vpack.c.bf16 %v504_v55, %v504_v55  ;;  %v1912_v55 = vld [vmem:[%s2380_s5 + $0xa8] sm:$0xff] }
  0xeb   : > { %1056 = vmatpush.bf16.msra.mxu2 %v1914_v53 }
  0xec   : > { %v672_v59 = vunpack.c.l.b16 %v519_v56  ;;  %v1911_v56 = vld [vmem:[%s2380_s5 + $0xa0] sm:$0xff] }
  0xef   : > { %1057 = vmatpush.bf16.msra.mxu2 %v1913_v54  ;;  %v1921_v54 = vld [vmem:[%s2383_s8 + $0x28] sm:$0xff] }
  0xf1   : > { %v506_v57 = vpop.f32.mrf.mxu0 }
  0xf2   : > { %v520_v58 = vpack.c.bf16 %v506_v57, %v506_v57  ;;  %v1910_v57 = vld [vmem:[%s2380_s5 + $0x98] sm:$0xff] }
  0xf3   : > { %1058 = vmatpush.bf16.msra.mxu2 %v1912_v55 }
  0xf4   : > { %v673_v60 = vunpack.c.l.b16 %v520_v58 }
  0xf6   : > { %v675_v61 = vpack.c.b16 %v673_v60, %v672_v59  ;;  %v1909_v59 = vld [vmem:[%s2380_s5 + $0x90] sm:$0xff]  ;;  %v1908_v60 = vld [vmem:[%s2380_s5 + $0x88] sm:$0xff] }
  0xf7   : > { %1059 = vmatpush.bf16.msra.mxu2 %v1911_v56 }
  0xf8   : > { %1588 = vmatmul.msk.bf16.gmra.mxu3 %vm572_vm1, %v675_v61 }
  0xfb   : > { %1060 = vmatpush.bf16.msra.mxu2 %v1910_v57 }
  0xff   : > { %1061 = vmatpush.bf16.msra.mxu2 %v1909_v59  ;;  %v1920_v59 = vld [vmem:[%s2383_s8 + $0x20] sm:$0xff] }
 0x103   : > { %1062 = vmatpush.bf16.msra.mxu2 %v1908_v60 }
 0x12b   : > { %v647_v63 = vpop.f32.mrf.mxu2 }
 0x133   : > { %v649_v2 = vpop.f32.mrf.mxu2 }
 0x13b   : > { %v652_v6 = vpop.f32.mrf.mxu2 }
 0x143   : > { %v654_v19 = vpop.f32.mrf.mxu2 }
 0x145   : > { %v588_v62 = vpop.f32.mrf.mxu1 }
 0x146   : > { %v648_v5 = vadd.f32 %v647_v63, %v588_v62 }
 0x14d   : > { %v590_v0 = vpop.f32.mrf.mxu1 }
 0x14e   : > { %v650_v13 = vadd.f32 %v649_v2, %v590_v0  ;;  %v1907_v0 = vld [vmem:[%s2380_s5 + $0x80] sm:$0xff] }
 0x14f   : > { %1063 = vmatpush.bf16.msra.mxu2 %v1907_v0  ;;  %v1919_v0 = vld [vmem:[%s2383_s8 + $0x18] sm:$0xff] }
 0x155   : > { %v593_v4 = vpop.f32.mrf.mxu1 }
 0x156   : > { %v653_v9 = vadd.f32 %v652_v6, %v593_v4 }
 0x15d   : > { %v595_v15 = vpop.f32.mrf.mxu1 }
 0x15e   : > { %v655_v20 = vadd.f32 %v654_v19, %v595_v15 }
 0x16b   : > { %v715_v1 = vpop.f32.mrf.mxu3 }
 0x16c   : > { %v725_v7 = vadd.f32 %v715_v1, %v648_v5 }
 0x16e   : > { %v733_v11 = vadd.f32 %v1980_v8, %v725_v7 }
 0x170   : > { %v737_v16 = vmax.f32 %v733_v11, 0.0 }
 0x173   : > { %v717_v3 = vpop.f32.mrf.mxu3 }
 0x174   : > { %v726_v17 = vadd.f32 %v717_v3, %v650_v13 }
 0x176   : > { %v734_v23 = vadd.f32 %v1980_v8, %v726_v17 }
 0x178   : > { %v738_v26 = vmax.f32 %v734_v23, 0.0  ;;  %v1939_v23 = vld [vmem:[%s2383_s8 + $0xb8] sm:$0xff] }
 0x179   : > { %1350 = vmatpush.bf16.msrb.mxu0 %v1939_v23 }
 0x17a   : > { %v754_v33 = vpack.c.bf16 %v738_v26, %v737_v16 }
 0x17b   : > { %v720_v10 = vpop.f32.mrf.mxu3 }
 0x17c   : > { %v727_v12 = vadd.f32 %v720_v10, %v653_v9 }
 0x17e   : > { %v735_v14 = vadd.f32 %v1980_v8, %v727_v12 }
 0x180   : > { %v739_v18 = vmax.f32 %v735_v14, 0.0 }
 0x182   : > { %v741_v21 = vsub.f32 %v739_v18, %v737_v16 }
 0x183   : > { %v722_v22 = vpop.f32.mrf.mxu3 }
 0x184   : > { %v728_v24 = vadd.f32 %v722_v22, %v655_v20  ;;  %v743_v30 = vand.u32 2147483647, %v741_v21 }
 0x186   : > { %v736_v25 = vadd.f32 %v1980_v8, %v728_v24 }
 0x188   : > { %v740_v27 = vmax.f32 %v736_v25, 0.0  ;;  %v1981_v25 = vld [vmem:[%s2381_s6] ss:$0 sm:$0xff] }
 0x18a   : > { %v742_v28 = vsub.f32 %v740_v27, %v738_v26  ;;  %v755_v29 = vpack.c.bf16 %v740_v27, %v739_v18  ;;  %v1938_v27 = vld [vmem:[%s2383_s8 + $0xb0] sm:$0xff] }
 0x18b   : > { %1351 = vmatpush.bf16.msrb.mxu0 %v1938_v27 }
 0x18c   : > { %v744_v31 = vand.u32 2147483647, %v742_v28  ;;  %792 = vmatpush.bf16.msrb.mxu1 %v755_v29  ;;  %v1931_v28 = vld [vmem:[%s2383_s8 + $0x78] sm:$0xff] }
 0x18e   : > { %v2182_v32 = vadd.f32 %v744_v31, %v743_v30 }
 0x18f   : > { %1352 = vmatpush.bf16.msrb.mxu0 %v1937_v36 }
 0x190   : > { %793 = vmatpush.bf16.msrb.mxu1 %v754_v33  ;;  %v746_v29 = vrot.slane %v2182_v32, 4  ;;  %v1930_v33 = vld [vmem:[%s2383_s8 + $0x70] sm:$0xff] }
 0x192   : > { %v747_v37 = vadd.f32 %v746_v29, %v2182_v32 }
 0x193   : > { %1601 = vmatmul.msk.bf16.vlgmr.msrb.gmra.mxu1 %vm451_vm0, %v1888_v34 }
 0x194   : > { %1211 = vmatpush.bf16.msra.mxu1 %v1931_v28 }
 0x198   : > { %1212 = vmatpush.bf16.msra.mxu1 %v1930_v33 }
 0x19c   : > { %1213 = vmatpush.bf16.msra.mxu1 %v1929_v39 }
 0x1a0   : > { %1214 = vmatpush.bf16.msra.mxu1 %v1928_v47 }
 0x1a3   : > { %1602 = vmatmul.msk.bf16.gmra.mxu1 %vm451_vm0, %v1889_v43  ;;  %v1936_v43 = vld [vmem:[%s2383_s8 + $0xa0] sm:$0xff] }
 0x1a4   : > { %1353 = vmatpush.bf16.msrb.mxu0 %v1936_v43 }
 0x1a8   : > { %1354 = vmatpush.bf16.msrb.mxu0 %v1935_v50 }
 0x1b3   : > { %1603 = vmatmul.msk.bf16.gmra.mxu1 %vm451_vm0, %v1890_v44  ;;  %v748_v44 = vrot.slane %v747_v37, 2 }
 0x1b5   : > { %v749_v51 = vadd.f32 %v748_v44, %v747_v37 }
 0x1b7   : > { %v750_v55 = vrot.slane %v749_v51, 1 }
 0x1b9   : > { %v751_v60 = vadd.f32 %v750_v55, %v749_v51 }
 0x210   : > { %v795_v58 = vpop.f32.mrf.mxu1 }
 0x211   : > { %v810_v61 = vpack.c.bf16 %v795_v58, %v795_v58  ;;  %v1093_v58 = vld [vmem:[%s2382_s7 + $0x8] sm:$0xf] }
 0x213   : > { %v919_v1 = vunpack.c.l.b16 %v810_v61 }
 0x218   : > { %v797_v62 = vpop.f32.mrf.mxu1 }
 0x219   : > { %v811_v63 = vpack.c.bf16 %v797_v62, %v797_v62  ;;  %v1099_v62 = vunpack.c.l.b16 %v1093_v58 }
 0x21b   : > { %v920_v2 = vunpack.c.l.b16 %v811_v63 }
 0x21d   : > { %v921_v3 = vpack.c.b16 %v920_v2, %v919_v1  ;;  %v752_v1 = vmul.f32 0.00012207031, %v751_v60 }
 0x21f   : > { %979 = vmatmul.bf16.vlgmr.msrb.gmra.mxu3 %v921_v3  ;;  %v1101_v3 = vpack.c.b16 %v1099_v62, %v1099_v62 }
 0x220   : > { %v800_v4 = vpop.f32.mrf.mxu1 }
 0x221   : > { %v812_v5 = vpack.c.bf16 %v800_v4, %v800_v4 }
 0x223   : > { %v851_v8 = vunpack.c.l.b16 %v812_v5  ;;  %v1918_v5 = vld [vmem:[%s2383_s8 + $0x10] sm:$0xff] }
 0x228   : > { %v802_v6 = vpop.f32.mrf.mxu1 }
 0x229   : > { %v813_v7 = vpack.c.bf16 %v802_v6, %v802_v6  ;;  %v1927_v6 = vld [vmem:[%s2383_s8 + $0x58] sm:$0xff] }
 0x22a   : > { %1215 = vmatpush.bf16.msra.mxu1 %v1927_v6 }
 0x22b   : > { %v852_v9 = vunpack.c.l.b16 %v813_v7  ;;  %v1917_v7 = vld [vmem:[%s2383_s8 + $0x8] sm:$0xff] }
 0x22d   : > { %v853_v10 = vpack.c.b16 %v852_v9, %v851_v8  ;;  %v1926_v8 = vld [vmem:[%s2383_s8 + $0x50] sm:$0xff]  ;;  %v1916_v9 = vld [vmem:[%s2383_s8] sm:$0xff] }
 0x22e   : > { %1216 = vmatpush.bf16.msra.mxu1 %v1926_v8 }
 0x22f   : > { %911 = vmatmul.bf16.vlgmr.msrb.gmra.mxu2 %v853_v10  ;;  %v1925_v10 = vld [vmem:[%s2383_s8 + $0x48] sm:$0xff] }
 0x230   : > { %v805_v11 = vpop.f32.mrf.mxu1 }
 0x231   : > { %v814_v12 = vpack.c.bf16 %v805_v11, %v805_v11  ;;  %v1934_v11 = vld [vmem:[%s2383_s8 + $0x90] sm:$0xff] }
 0x232   : > { %1217 = vmatpush.bf16.msra.mxu1 %v1925_v10  ;;  %1355 = vmatpush.bf16.msrb.mxu0 %v1934_v11 }
 0x233   : > { %v1004_v15 = vunpack.c.l.b16 %v814_v12  ;;  %v1924_v12 = vld [vmem:[%s2383_s8 + $0x40] sm:$0xff] }
 0x236   : > { %1218 = vmatpush.bf16.msra.mxu1 %v1924_v12 }
 0x238   : > { %v807_v13 = vpop.f32.mrf.mxu1 }
 0x239   : > { %v815_v14 = vpack.c.bf16 %v807_v13, %v807_v13  ;;  %v1933_v13 = vld [vmem:[%s2383_s8 + $0x88] sm:$0xff] }
 0x23a   : > { %1356 = vmatpush.bf16.msrb.mxu0 %v1933_v13 }
 0x23b   : > { %v1005_v16 = vunpack.c.l.b16 %v815_v14  ;;  %v1932_v14 = vld [vmem:[%s2383_s8 + $0x80] sm:$0xff] }
 0x23d   : > { %v1006_v17 = vpack.c.b16 %v1005_v16, %v1004_v15 }
 0x23e   : > { %1357 = vmatpush.bf16.msrb.mxu0 %v1932_v14 }
 0x23f   : > { %1064 = vmatmul.bf16.vlgmr.msra.gmra.mxu2 %v1006_v17 }
 0x2a2   : > { %v980_v20 = vpop.f32.mrf.mxu3 }
 0x2aa   : > { %v982_v26 = vpop.f32.mrf.mxu3 }
 0x2b2   : > { %v912_v18 = vpop.f32.mrf.mxu2 }
 0x2b3   : > { %v981_v22 = vadd.f32 %v980_v20, %v912_v18 }
 0x2ba   : > { %v914_v19 = vpop.f32.mrf.mxu2 }
 0x2bb   : > { %v983_v30 = vadd.f32 %v982_v26, %v914_v19  ;;  %v1982_v26 = vld [vmem:[%s2384_s9] ss:$0 sm:$0xff] }
 0x2c2   : > { %v1065_v21 = vpop.f32.mrf.mxu2 }
 0x2c3   : > { %v1070_v24 = vadd.f32 %v1065_v21, %v981_v22 }
 0x2c5   : > { %v1076_v34 = vadd.f32 %v1981_v25, %v1070_v24 }
 0x2c7   : > { %v1078_v40 = vmax.f32 %v1076_v34, 0.0 }
 0x2ca   : > { %v1067_v31 = vpop.f32.mrf.mxu2 }
 0x2cb   : > { %v1071_v35 = vadd.f32 %v1067_v31, %v983_v30 }
 0x2cd   : > { %v1077_v38 = vadd.f32 %v1981_v25, %v1071_v35 }
 0x2cf   : > { %v1079_v41 = vmax.f32 %v1077_v38, 0.0 }
 0x2d1   : > { %v1080_v45 = vsub.f32 %v1079_v41, %v1078_v40  ;;  %v1090_v32 = vpack.c.bf16 %v1079_v41, %v1078_v40 }
 0x2d3   : > { %v1081_v48 = vand.u32 2147483647, %v1080_v45  ;;  %1116 = vmatpush.bf16.msra.mxu3 %v1090_v32 }
 0x2d5   : > { %v1082_v52 = vrot.slane %v1081_v48, 4 }
 0x2d6   : > { %1736 = vmatmul.msk.bf16.vlgmr.msra.gmra.mxu3 %vm1102_vm2, %v1915_v46 }
 0x2d7   : > { %1272 = vmatpush.bf16.msrb.mxu3 %v1923_v42  ;;  %v1083_v53 = vadd.f32 %v1082_v52, %v1081_v48 }
 0x2d9   : > { %v1084_v56 = vrot.slane %v1083_v53, 2 }
 0x2db   : > { %1273 = vmatpush.bf16.msrb.mxu3 %v1922_v49  ;;  %v1085_v57 = vadd.f32 %v1084_v56, %v1083_v53 }
 0x2dd   : > { %v1086_v61 = vrot.slane %v1085_v57, 1 }
 0x2df   : > { %1274 = vmatpush.bf16.msrb.mxu3 %v1921_v54  ;;  %v1087_v63 = vadd.f32 %v1086_v61, %v1085_v57 }
 0x2e1   : > { %v1088_v2 = vmul.f32 0.00014648438, %v1087_v63 }
 0x2e3   : > { %1275 = vmatpush.bf16.msrb.mxu3 %v1920_v59  ;;  %v1089_v4 = vadd.f32 %v1088_v2, %v752_v1 }
 0x2e6   : > { %1737 = vmatmul.msk.bf16.gmra.mxu3 %vm1102_vm2, %v1101_v3 }
 0x2e7   : > { %1276 = vmatpush.bf16.msrb.mxu3 %v1919_v0 }
 0x2eb   : > { %1277 = vmatpush.bf16.msrb.mxu3 %v1918_v5 }
 0x2ef   : > { %1278 = vmatpush.bf16.msrb.mxu3 %v1917_v7 }
 0x2f3   : > { %1279 = vmatpush.bf16.msrb.mxu3 %v1916_v9 }
 0x359   : > { %v1118_v15 = vpop.f32.mrf.mxu3 }
 0x35a   : > { %v1127_v16 = vpack.c.bf16 %v1118_v15, %v1118_v15 }
 0x35c   : > { %1280 = vmatmul.bf16.vlgmr.msrb.gmra.mxu3 %v1127_v16 }
 0x361   : > { %v1120_v17 = vpop.f32.mrf.mxu3 }
 0x362   : > { %v1128_v18 = vpack.c.bf16 %v1120_v17, %v1120_v17 }
 0x364   : > { %1219 = vmatmul.bf16.vlgmr.msra.gmra.mxu1 %v1128_v18 }
 0x369   : > { %v1123_v19 = vpop.f32.mrf.mxu3 }
 0x36a   : > { %v1129_v20 = vpack.c.bf16 %v1123_v19, %v1123_v19 }
 0x36c   : > { %1358 = vmatmul.bf16.vlgmr.msrb.gmra.mxu0 %v1129_v20 }
 0x371   : > { %v1125_v21 = vpop.f32.mrf.mxu3 }
 0x3df   : > { %v1281_v22 = vpop.f32.mrf.mxu3 }
 0x3e1   : > { %v1220_v23 = vpop.f32.mrf.mxu1 }
 0x3e2   : > { %v1282_v25 = vadd.f32 %v1281_v22, %v1220_v23 }
 0x3e7   : > { %v1283_v24 = vpop.f32.mrf.mxu3 }
 0x3e9   : > { %v1359_v27 = vpop.f32.mrf.mxu0  ;;  %v1222_v28 = vpop.f32.mrf.mxu1 }
 0x3ea   : > { %v1363_v29 = vadd.f32 %v1359_v27, %v1282_v25 }
 0x3ec   : > { %v1368_v30 = vadd.f32 %v1982_v26, %v1363_v29 }
 0x3ee   : > { %v1369_v31 = vmax.f32 %v1368_v30, 0.0 }
 0x3f0   : > { %v1371_v33 = vrot.slane %v1369_v31, 4 }
 0x3f1   : > { %v1361_v34 = vpop.f32.mrf.mxu0 }
 0x3f2   : > { %v1373_v35 = vsub.f32 %v1369_v31, %v1371_v33 }
 0x3f4   : > { %v1374_v36 = vand.u32 2147483647, %v1373_v35 }
 0x3f6   : > { %v1376_v37 = vrot.slane %v1374_v36, 4 }
 0x3f8   : > { %v1379_v38 = vsel %vm1378_vm3, %v1376_v37, 0.0 }
 0x3f9   : > { %v1380_v39 = vrot.slane %v1379_v38, 4 }
 0x3fb   : > { %v1381_v40 = vadd.f32 %v1380_v39, %v1379_v38 }
 0x3fd   : > { %v1382_v41 = vrot.slane %v1381_v40, 2 }
 0x3ff   : > { %v1383_v42 = vadd.f32 %v1382_v41, %v1381_v40 }
 0x401   : > { %v1384_v43 = vrot.slane %v1383_v42, 1 }
 0x403   : > { %v1385_v44 = vadd.f32 %v1384_v43, %v1383_v42 }
 0x405   : > { %v1386_v45 = vmul.f32 0.0001953125, %v1385_v44 }
 0x407   : > { %v1387_v32 = vadd.f32 %v1386_v45, %v1089_v4 }
 0x409   : > { %1388 = vst [vmem:[%s391_s25] sm:$0x1] %v1387_v32 }
 0x40a PF: > { %s20_s17 = sadd.s32 1, %s2021_s17   ;;  %s2386_s13 = smov %s2013_s15 }
 0x40b   : > { %p17_p7 = scmp.ge.s32.totalorder %s20_s17, 6   ;;  %s2387_s14 = smov %s2017_s16 }
 0x40c   : > { %s2388_s15 = smov %s2391_s18  ;;  %s2389_s16 = smov %s2395_s19 }
 0x40d   :  { %19 = sbr.rel (!%p17_p7) target bundleno = 3 (0x3), region = 96 }

</bundles_post_ra>
